<compile_context>
chip_gen: v7x
topology: tpu7x:2x2x1
jax: 0.10.0
libtpu: 0.0.40
codegen_flags: <defaults>
</compile_context>

<pallas_src>
from abc import ABCMeta
from functools import wraps

import numpy as np

import jax
import jax.numpy as jnp
from jax.experimental import pallas as pl
from jax.experimental.pallas import tpu as pltpu


_LANE = 128          # lane granule (last dim)
_SUBLANE_BF16 = 16   # bf16 packs 2 rows/sublane -> native (16, 128) tile


# ----------------------------------------------------------------------------
# Tiling helpers
# ----------------------------------------------------------------------------
def _round_up(x, m):
    return ((x + m - 1) // m) * m


def _pick_tile(dim, candidates):
    """Largest candidate that divides `dim`; falls back to `dim` itself."""
    for c in candidates:
        if c <= dim and dim % c == 0:
            return c
    return dim


def _tpu_vmem_capacity_bytes(default=128 * 1024 * 1024):
    try:
        cap = getattr(pltpu.get_tpu_info(), "vmem_capacity_bytes", None)
        if cap:
            return int(cap)
    except Exception:
        pass
    return default


def default_tm_max():
    # v5e / v6e: 128 MiB VMEM -> big M tiles.  v7x: 64 MiB VMEM, 2 TCs -> smaller
    # tiles so the parallel (M, N) grid can feed both TensorCores.
    return 512 if _tpu_vmem_capacity_bytes() <= (96 << 20) else 2048


def padded_token_count(tokens, tm_max):
    """Token-row padding rule shared by collate() and linear_head_pallas()."""
    mp0 = _round_up(max(int(tokens), 1), _SUBLANE_BF16)
    tm = min(tm_max, mp0)
    return _round_up(mp0, tm)


# ----------------------------------------------------------------------------
# Pallas kernels: linear head (matmul + bias epilogue)
# ----------------------------------------------------------------------------
def _linear_head_fused_kernel(x_ref, w_ref, b_ref, o_ref):
    # Single-K-tile path: one MXU pass per (i, j) tile, f32 accumulation inside
    # the dot, bias epilogue, lane-dense bf16 store.  No scratch, no pl.when.
    o_ref[...] = (
        jnp.dot(x_ref[...], w_ref[...], preferred_element_type=jnp.float32)
        + b_ref[...]
    ).astype(o_ref.dtype)


def _linear_head_acc_kernel(x_ref, w_ref, b_ref, o_ref, acc_ref):
    # Multi-K path (large hidden): f32 VMEM accumulator, K reduction last.
    k = pl.program_id(2)

    @pl.when(k == 0)
    def _init():
        acc_ref[...] = jnp.zeros_like(acc_ref)

    acc_ref[...] += jnp.dot(
        x_ref[...], w_ref[...], preferred_element_type=jnp.float32
    )

    @pl.when(k == pl.num_programs(2) - 1)
    def _finalize():
        # bias is (1, TN) f32, resident across K (index_map ignores k).
        o_ref[...] = (acc_ref[...] + b_ref[...]).astype(o_ref.dtype)


def linear_head_pallas(x_p, w_p, b_p, *, tm_max=None, tn_max=256,
                       tk_single_max=2048, out_dtype=jnp.bfloat16):
    """scores_p = x_p @ w_p + b_p on PRE-PADDED operands (no per-call pad/cast).

    x_p: [mp, kp]   bf16, mp % 16 == 0 (see padded_token_count), kp % 128 == 0
    w_p: [kp, np_]  bf16, np_ % 128 == 0
    b_p: [1, np_]   f32
    Returns [mp, np_] bf16 — lane-dense; callers slice rows / labels later.
    """
    mp, kp = x_p.shape
    kp_w, np_ = w_p.shape
    assert kp == kp_w, "hidden dims must match"
    assert b_p.shape == (1, np_), "bias must be pre-padded to (1, padded_labels)"
    assert mp % _SUBLANE_BF16 == 0 and kp % _LANE == 0 and np_ % _LANE == 0, (
        "operands must be pre-padded (tokens->16, hidden/labels->128)")

    vmem_cap = _tpu_vmem_capacity_bytes()
    small_vmem = vmem_cap <= (96 << 20)          # v7x-like: 64 MiB VMEM, 2 TCs
    if tm_max is None:
        tm_max = 512 if small_vmem else 2048

    tm = min(tm_max, mp)
    assert mp % tm == 0, "pad token rows with padded_token_count(tokens, tm_max)"

    tn_candidates = tuple(c for c in (512, 256, 128) if c <= tn_max) or (128,)
    tn = _pick_tile(np_, tn_candidates)

    single_k = kp <= tk_single_max
    tk_candidates = tuple(c for c in (1024, 512, 256, 128) if c <= tk_single_max) or (128,)
    tk = kp if single_k else _pick_tile(kp, tk_candidates)

    # v7x: make sure both TensorCores get at least one parallel block.
    if (small_vmem and (mp // tm) * (np_ // tn) < 2
            and tm >= 32 and (tm // 2) % _SUBLANE_BF16 == 0):
        tm //= 2

    m_blocks, n_blocks = mp // tm, np_ // tn

    if single_k:
        grid = (m_blocks, n_blocks)
        in_specs = [
            pl.BlockSpec((tm, kp), lambda i, j: (i, 0)),   # activations
            pl.BlockSpec((kp, tn), lambda i, j: (0, j)),   # weights
            pl.BlockSpec((1, tn), lambda i, j: (0, j)),    # bias
        ]
        out_specs = pl.BlockSpec((tm, tn), lambda i, j: (i, j))
        scratch_shapes = []
        kernel = _linear_head_fused_kernel
        semantics = ("parallel", "parallel")
        footprint = 2 * (tm * kp * 2 + kp * tn * 2 + tm * tn * 2 + tn * 4)
        x_reads = 1
    else:
        grid = (m_blocks, n_blocks, kp // tk)
        in_specs = [
            pl.BlockSpec((tm, tk), lambda i, j, k: (i, k)),   # activations
            pl.BlockSpec((tk, tn), lambda i, j, k: (k, j)),   # weights
            pl.BlockSpec((1, tn), lambda i, j, k: (0, j)),    # bias (ignores k)
        ]
        out_specs = pl.BlockSpec((tm, tn), lambda i, j, k: (i, j))
        scratch_shapes = [pltpu.VMEM((tm, tn), jnp.float32)]
        kernel = _linear_head_acc_kernel
        semantics = ("parallel", "parallel", "arbitrary")
        footprint = (2 * (tm * tk * 2 + tk * tn * 2 + tm * tn * 2 + tn * 4)
                     + tm * tn * 4)
        x_reads = n_blocks

    # Real double-buffered footprint x1.5 headroom, clamped under physical VMEM.
    vmem_limit = int(min(max(footprint * 3 // 2, 16 << 20), int(0.7 * vmem_cap)))

    cost = pl.CostEstimate(
        flops=int(2 * mp * kp * np_),
        transcendentals=0,
        bytes_accessed=int(x_reads * mp * kp * 2        # activations
                           + m_blocks * kp * np_ * 2    # weights re-read per M block
                           + m_blocks * np_ * 4         # bias
                           + mp * np_ * 2),             # output
    )

    return pl.pallas_call(
        kernel,
        out_shape=jax.ShapeDtypeStruct((mp, np_), out_dtype),
        grid_spec=pltpu.PrefetchScalarGridSpec(
            num_scalar_prefetch=0,
            grid=grid,
            in_specs=in_specs,
            out_specs=out_specs,
            scratch_shapes=scratch_shapes,
        ),
        compiler_params=pltpu.CompilerParams(
            dimension_semantics=semantics,
            vmem_limit_bytes=vmem_limit,
        ),
        cost_estimate=cost,
    )(x_p, w_p, b_p)


# ----------------------------------------------------------------------------
# Host-side TrainablePipe plumbing (caching / nested-dict collate), no torch.
# ----------------------------------------------------------------------------
def hash_batch(batch):
    if isinstance(batch, list):
        return hash(tuple(id(item) for item in batch))
    elif not isinstance(batch, dict):
        return id(batch)
    return hash((tuple(batch.keys()), tuple(map(hash_batch, batch.values()))))


def cached_collate(fn):
    @wraps(fn)
    def wrapped(self, batch, device):
        if self.pipeline is None or self.pipeline._cache is None:
            return fn(self, batch, device)
        cache_id = (id(self), "collate", hash_batch(batch))
        if cache_id in self.pipeline._cache:
            return self.pipeline._cache[cache_id]
        res = fn(self, batch, device)
        self.pipeline._cache[cache_id] = res
        res["cache_id"] = cache_id
        return res
    return wrapped


def cached_forward(fn):
    @wraps(fn)
    def wrapped(self, batch):
        if self.pipeline is None or self.pipeline._cache is None:
            return fn(self, batch)
        # NOTE: the reference implementation tags this key "collate" as well;
        # kept as-is to preserve the original module's semantics.
        cache_id = (id(self), "collate", hash_batch(batch))
        if cache_id in self.pipeline._cache:
            return self.pipeline._cache[cache_id]
        res = fn(self, batch)
        self.pipeline._cache[cache_id] = res
        return res
    return wrapped


def cached_preprocess(fn):
    @wraps(fn)
    def wrapped(self, doc):
        if self.pipeline is None or self.pipeline._cache is None:
            return fn(self, doc)
        cache_id = (id(self), "preprocess", id(doc))
        if cache_id in self.pipeline._cache:
            return self.pipeline._cache[cache_id]
        res = fn(self, doc)
        self.pipeline._cache[cache_id] = res
        return res
    return wrapped


def cached_preprocess_supervised(fn):
    @wraps(fn)
    def wrapped(self, doc):
        if self.pipeline is None or self.pipeline._cache is None:
            return fn(self, doc)
        cache_id = (id(self), "preprocess_supervised", id(doc))
        if cache_id in self.pipeline._cache:
            return self.pipeline._cache[cache_id]
        res = fn(self, doc)
        self.pipeline._cache[cache_id] = res
        return res
    return wrapped


class TrainablePipeMeta(ABCMeta):
    def __new__(mcs, name, bases, class_dict):
        if "preprocess" in class_dict:
            class_dict["preprocess"] = cached_preprocess(class_dict["preprocess"])
        if "preprocess_supervised" in class_dict:
            class_dict["preprocess_supervised"] = cached_preprocess_supervised(
                class_dict["preprocess_supervised"]
            )
        if "collate" in class_dict:
            class_dict["collate"] = cached_collate(class_dict["collate"])
        if "forward" in class_dict:
            class_dict["forward"] = cached_forward(class_dict["forward"])
        return super().__new__(mcs, name, bases, class_dict)


class Pipeline:
    """Minimal stand-in exposing the shared _cache the decorators rely on."""

    def __init__(self):
        self._cache = None

    def enable_cache(self):
        self._cache = {}

    def disable_cache(self):
        self._cache = None


def _merge_feature_dicts(feats):
    """Mirror of batch_compress_dict/decompress_dict for flat/nested dicts."""
    out = {}
    for k in feats[0]:
        vals = [f[k] for f in feats]
        if vals and isinstance(vals[0], dict):
            out[k] = _merge_feature_dicts(vals)
        else:
            out[k] = vals
    return out


class TrainablePipe(metaclass=TrainablePipeMeta):
    # TODO(synk): torch.nn.Module parameter registration and the
    # save_extra_data / load_extra_data / post_init file-walking helpers have
    # no Pallas equivalent; parameters are held as plain JAX arrays.

    def __init__(self, pipeline, name):
        self.pipeline = pipeline
        self.name = name
        self.cfg = {}
        self._children = {}

    @property
    def device(self):
        return jax.devices()[0]

    def named_component_children(self):
        for name, module in self._children.items():
            if isinstance(module, TrainablePipe):
                yield name, module

    def preprocess(self, doc):
        return {name: c.preprocess(doc) for name, c in self.named_component_children()}

    def preprocess_supervised(self, doc):
        return self.preprocess(doc)

    def collate(self, batch, device):
        return {
            name: c.collate(batch[name], device)
            for name, c in self.named_component_children()
        }

    def forward(self, batch):
        raise NotImplementedError()

    def module_forward(self, batch):
        return self.forward(batch)

    def make_batch(self, docs, supervision=False):
        feats = [
            self.preprocess_supervised(d) if supervision else self.preprocess(d)
            for d in docs
        ]
        return _merge_feature_dicts(feats)

    def batch_process(self, docs):
        batch = self.make_batch(docs)
        inputs = self.collate(batch, device=self.device)
        res = self.module_forward(inputs)
        return self.postprocess(docs, res)

    def postprocess(self, docs, batch):
        return docs

    def clean_gold_for_evaluation(self, gold):
        return gold

    def __call__(self, doc):
        return self.batch_process([doc])[0]


class LinearScoringPipe(TrainablePipe):
    """Concrete TrainablePipe: per-token linear scoring head (Pallas forward)."""

    def __init__(self, pipeline, name, *, hidden, n_labels, key):
        super().__init__(pipeline, name)
        self.hidden = hidden
        self.n_labels = n_labels
        self.hidden_p = _round_up(hidden, _LANE)
        self.labels_p = _round_up(n_labels, _LANE)
        self._tm_max = default_tm_max()

        kw, kb = jax.random.split(key)
        w = (jax.random.normal(kw, (hidden, n_labels), jnp.float32)
             / jnp.sqrt(jnp.float32(hidden)))
        b = jax.random.normal(kb, (n_labels,), jnp.float32) * 0.1
        # Unpadded params kept for inspection / reference math.
        self.weight = w.astype(jnp.bfloat16)
        self.bias = b
        # Padded + cast ONCE here; forward never pads or casts the parameters.
        self.weight_p = jnp.pad(
            self.weight,
            ((0, self.hidden_p - hidden), (0, self.labels_p - n_labels)),
        )
        self.bias_p = jnp.pad(b, (0, self.labels_p - n_labels)).reshape(1, self.labels_p)

    def preprocess(self, doc):
        return {"embedding": doc["embedding"]}

    def collate(self, batch, device):
        # Ragged docs -> ONE pre-padded bf16 host buffer -> ONE device transfer.
        embs = batch["embedding"]
        lengths = [int(e.shape[0]) for e in embs]        # host ints: no sync later
        n_tokens = sum(lengths)
        mp = padded_token_count(n_tokens, self._tm_max)
        slab = np.zeros((mp, self.hidden_p), dtype=jnp.bfloat16)
        off = 0
        for e, ln in zip(embs, lengths):
            slab[off:off + ln, :self.hidden] = (
                np.asarray(e, np.float32).astype(jnp.bfloat16)
            )
            off += ln
        x_p = jax.device_put(slab, device) if device is not None else jnp.asarray(slab)
        return {"embedding": x_p, "lengths": lengths, "n_tokens": n_tokens}

    def forward(self, batch):
        # Lane-dense padded scores; the label dim is sliced only in postprocess.
        scores_p = linear_head_pallas(
            batch["embedding"], self.weight_p, self.bias_p, tm_max=self._tm_max
        )
        return {"scores": scores_p,
                "lengths": batch["lengths"],
                "n_tokens": batch["n_tokens"]}

    def postprocess(self, docs, batch):
        scores = batch["scores"]
        off = 0
        for doc, ln in zip(docs, batch["lengths"]):      # host ints -> no device sync
            doc["scores"] = scores[off:off + ln, :self.n_labels]
            off += ln
        return docs


# ----------------------------------------------------------------------------
# Demo / self-check
# ----------------------------------------------------------------------------
if __name__ == "__main__":
    key = jax.random.PRNGKey(0)
    k_docs, k_params, k_mk = jax.random.split(key, 3)

    hidden, n_labels = 32, 5
    doc_lens = [7, 9]  # 2 ragged "documents", 16 tokens total

    docs = []
    for i, length in enumerate(doc_lens):
        emb = jax.random.normal(
            jax.random.fold_in(k_docs, i), (length, hidden), dtype=jnp.float32
        )
        docs.append({"embedding": emb})

    pipeline = Pipeline()
    pipeline.enable_cache()
    pipe = LinearScoringPipe(
        pipeline, "scorer", hidden=hidden, n_labels=n_labels, key=k_params
    )

    # Host-side plumbing (cached preprocess -> collate), then the Pallas forward.
    batch = pipe.make_batch(docs)
    inputs = pipe.collate(batch, device=pipe.device)
    out = pipe.forward(inputs)
    out_again = pipe.forward(inputs)  # exercises cached_forward
    assert out_again is out, "cached_forward should return the cached result"

    n_tokens = sum(doc_lens)
    scores_p = out["scores"]
    jax.block_until_ready(scores_p)
    assert scores_p.shape[0] >= n_tokens and scores_p.shape[1] == pipe.labels_p

    # Correctness vs plain-JAX reference (same bf16 inputs, f32 math).
    x_valid = inputs["embedding"][:n_tokens, :hidden]
    ref = (x_valid.astype(jnp.float32) @ pipe.weight.astype(jnp.float32)
           + pipe.bias).astype(jnp.bfloat16)
    got = scores_p[:n_tokens, :n_labels]
    max_err = float(jnp.max(jnp.abs(got.astype(jnp.float32) - ref.astype(jnp.float32))))
    assert max_err < 5e-2, f"single-K kernel mismatch, max abs err = {max_err}"

    # Split scores back per document (postprocess plumbing, host-int lengths).
    docs = pipe.postprocess(docs, out)
    assert docs[0]["scores"].shape == (doc_lens[0], n_labels)
    assert docs[1]["scores"].shape == (doc_lens[1], n_labels)

    # Also exercise the multi-K accumulator path (forced K split on tiny shapes).
    mk_tokens, mk_hidden, mk_labels = 32, 256, 128
    xk = jax.random.normal(jax.random.fold_in(k_mk, 0),
                           (mk_tokens, mk_hidden), jnp.float32).astype(jnp.bfloat16)
    wk = (jax.random.normal(jax.random.fold_in(k_mk, 1),
                            (mk_hidden, mk_labels), jnp.float32) / 16.0
          ).astype(jnp.bfloat16)
    bk = (jax.random.normal(jax.random.fold_in(k_mk, 2),
                            (mk_labels,), jnp.float32) * 0.1).reshape(1, mk_labels)
    out_mk = linear_head_pallas(xk, wk, bk, tk_single_max=128)   # -> 2 K steps
    jax.block_until_ready(out_mk)
    ref_mk = (xk.astype(jnp.float32) @ wk.astype(jnp.float32) + bk).astype(jnp.bfloat16)
    err_mk = float(jnp.max(jnp.abs(out_mk.astype(jnp.float32)
                                   - ref_mk.astype(jnp.float32))))
    assert err_mk < 5e-2, f"multi-K kernel mismatch, max abs err = {err_mk}"

    print("KERNEL_OK")
</pallas_src>

<mosaic_0001>
module attributes {stable_mosaic.version = 11 : i64} {
  func.func @_linear_head_fused_kernel(%arg0: i32, %arg1: i32, %arg2: memref<16x128xbf16, #tpu.memory_space<vmem>>, %arg3: memref<128x128xbf16, #tpu.memory_space<vmem>>, %arg4: memref<1x128xf32, #tpu.memory_space<vmem>>, %arg5: memref<16x128xbf16, #tpu.memory_space<vmem>>) attributes {dimension_semantics = [#tpu.dimension_semantics<parallel>, #tpu.dimension_semantics<parallel>], iteration_bounds = array<i64: 1, 1>, scalar_prefetch = 0 : i64, scratch_operands = 0 : i64, tpu.core_type = #tpu.core_type<tc>, window_params = [{transform_indices = @transform_0, window_bounds = array<i64: 16, 128>}, {transform_indices = @transform_1, window_bounds = array<i64: 128, 128>}, {transform_indices = @transform_2, window_bounds = array<i64: 1, 128>}, {transform_indices = @transform_3, window_bounds = array<i64: 16, 128>}]} {
    %c0 = arith.constant 0 : index
    %c0_0 = arith.constant 0 : index
    %0 = vector.load %arg2[%c0, %c0_0] : memref<16x128xbf16, #tpu.memory_space<vmem>>, vector<16x128xbf16>
    %c0_1 = arith.constant 0 : index
    %c0_2 = arith.constant 0 : index
    %1 = vector.load %arg3[%c0_1, %c0_2] : memref<128x128xbf16, #tpu.memory_space<vmem>>, vector<128x128xbf16>
    %cst = arith.constant dense<0.000000e+00> : vector<16x128xf32>
    %2 = tpu.matmul %0, %1, %cst {dimension_numbers = #tpu.dot_dimension_numbers<[1], [0], [0], [1], [0, 0, 1, 1], [], []>} : vector<16x128xbf16>, vector<128x128xbf16>, vector<16x128xf32> -> vector<16x128xf32>
    %c0_3 = arith.constant 0 : index
    %c0_4 = arith.constant 0 : index
    %3 = vector.load %arg4[%c0_3, %c0_4] : memref<1x128xf32, #tpu.memory_space<vmem>>, vector<1x128xf32>
    %4 = vector.broadcast %3 : vector<1x128xf32> to vector<16x128xf32>
    %5 = arith.addf %2, %4 : vector<16x128xf32>
    %6 = arith.truncf %5 : vector<16x128xf32> to vector<16x128xbf16>
    %c0_5 = arith.constant 0 : index
    %c0_6 = arith.constant 0 : index
    %7 = vector.load %arg5[%c0_5, %c0_6] : memref<16x128xbf16, #tpu.memory_space<vmem>>, vector<16x128xbf16>
    tpu.vector_store %arg5[%c0_5, %c0_6], %6 {strides = array<i32>} : memref<16x128xbf16, #tpu.memory_space<vmem>>, vector<16x128xbf16>,
    return
  }
  func.func @transform_0(%arg0: i32, %arg1: i32) -> (i32, i32) {
    %c0_i32 = arith.constant 0 : i32
    %c0_i32_0 = arith.constant 0 : i32
    return %arg0, %c0_i32 : i32, i32
  }
  func.func @transform_1(%arg0: i32, %arg1: i32) -> (i32, i32) {
    %c0_i32 = arith.constant 0 : i32
    %c0_i32_0 = arith.constant 0 : i32
    return %c0_i32, %arg1 : i32, i32
  }
  func.func @transform_2(%arg0: i32, %arg1: i32) -> (i32, i32) {
    %c0_i32 = arith.constant 0 : i32
    %c0_i32_0 = arith.constant 0 : i32
    return %c0_i32, %arg1 : i32, i32
  }
  func.func @transform_3(%arg0: i32, %arg1: i32) -> (i32, i32) {
    %c0_i32 = arith.constant 0 : i32
    return %arg0, %arg1 : i32, i32
  }
}

</mosaic_0001>

<bundles_post_ra>
// kernel: tpu_custom_call.1
= control target key start
LH: loop header
LB: loop body
LE: loop exit
PB: predicated region body
PF: predicated region fallthrough
CT: control target
= control target key end

     0   :  { %8 = vsyncpa [#allocation3], 0  ;;  %s403_s0 = inlined_call_operand.hbm [shape: bf16[16,128], index: 0, kind: input, shape index: {}]   ;;  %s404_s1 = inlined_call_operand.hbm [shape: bf16[128,128], index: 1, kind: input, shape index: {}]   ;;  %s405_s2 = inlined_call_operand.vmem [shape: f32[1,128], index: 2, kind: input, shape index: {}]   ;;  %s406_s3 = inlined_call_operand.hbm [shape: bf16[16,128], index: 3, kind: output, shape index: {}]  }
   0x1   :  { %9 = vsyncpa [#allocation6], 0 }
   0x2   :  { %10 = vsyncpa [#allocation4], 0  ;;  %s328_s12 = smov [#allocation2]   ;;  %s256_s16 = scalar_lea.hbm %s403_s0, 128 }
   0x3   :  { %s16_s13 = sshll.u32 %s328_s12, 4  ;;  %p257_p0 = scmp.ne.s32.totalorder %s403_s0, %s256_s16  ;;  %s17_s13 = int_to_ptr.vmem [resolvable:$true] %s16_s13 }
   0x4   :  { %p260_p1 = scmp.lt.u32.totalorder %s256_s16, %s403_s0 }
   0x6   :  { %p262_p2 = pnand %p260_p1, %p257_p0 }
   0x8   :  { %265 = shalt.err (!%p262_p2)
}
   0x9   :  { %s266_s21 = scalar_lea.vmem %s17_s13, 128  ;;  %p271_p4 = scmp.lt.s32.totalorder %s17_s13, %s17_s13 }
   0xa   :  { %p267_p3 = scmp.ne.s32.totalorder %s17_s13, %s266_s21  ;;  %p272_p5 = scmp.lt.s32.totalorder %s266_s21, %s266_s21 }
   0xc   :  { %p273_p6 = por %p272_p5, %p271_p4 }
   0xe   :  { %p274_p7 = pnand %p273_p6, %p267_p3 }
  0x10   :  { %277 = shalt.err (!%p274_p7)
}
  0x11   :  { %s329_s22 = smov 64   ;;  %s330_s23 = smov 4  }
  0x12   :  { %22 = dma.hbm_to_vmem [thread:$0]  %s403_s0, 128, %s17_s13, [#allocation3], %s329_s22, %s329_s22, %s330_s23  }
  0x13   :  { %s331_s26 = smov [#allocation5]   ;;  %s278_s30 = scalar_lea.hbm %s404_s1, 1024 }
  0x14   :  { %s28_s27 = sshll.u32 %s331_s26, 4  ;;  %p279_p8 = scmp.ne.s32.totalorder %s404_s1, %s278_s30  ;;  %s29_s27 = int_to_ptr.vmem [resolvable:$true] %s28_s27 }
  0x15   :  { %p282_p9 = scmp.lt.u32.totalorder %s278_s30, %s404_s1 }
  0x17   :  { %p284_p10 = pnand %p282_p9, %p279_p8 }
  0x19   :  { %287 = shalt.err (!%p284_p10)
}
  0x1a   :  { %s288_s8 = scalar_lea.vmem %s29_s27, 1024  ;;  %p293_p12 = scmp.lt.s32.totalorder %s29_s27, %s29_s27 }
  0x1b   :  { %p289_p11 = scmp.ne.s32.totalorder %s29_s27, %s288_s8  ;;  %p294_p13 = scmp.lt.s32.totalorder %s288_s8, %s288_s8 }
  0x1d   :  { %p295_p0 = por %p294_p13, %p293_p12 }
  0x1f   :  { %p296_p1 = pnand %p295_p0, %p289_p11 }
  0x21   :  { %299 = shalt.err (!%p296_p1)
}
  0x22   :  { %34 = dma.hbm_to_vmem [thread:$0]  %s404_s1, 1024, %s29_s27, [#allocation6], %s329_s22, %s329_s22, %s330_s23  }
  0x23   :  { %322 = dma.done.wait [#allocation3], 128  }
  0x24   :  { %323 = vsyncadd [#allocation3], 4294967168 }
  0x25   :  { %324 = dma.done.wait [#allocation6], 1024  }
  0x26   :  { %325 = vsyncadd [#allocation6], 4294966272  ;;  %v332_v0 = vmov 0.0   ;;  %vm333_vm0 = vmmov 0   ;;  %v247_v1 = vld [vmem:[#allocation5] sm:$0xff]   ;;  %v248_v2 = vld [vmem:[#allocation5 + $0x8] sm:$0xff]  }
  0x27   :  { %220 = vmatprep.subr.bf16.mxu0 %v332_v0  ;;  %236 = vmatprep.mubr.msk.bf16.mxu0 %vm333_vm0, %v332_v0  ;;  %v249_v3 = vld [vmem:[#allocation5 + $0x10] sm:$0xff]   ;;  %v250_v4 = vld [vmem:[#allocation5 + $0x18] sm:$0xff]   ;;  %v251_v5 = vld [vmem:[#allocation5 + $0x20] sm:$0xff]   ;;  %s334_s11 = smov [#allocation7]  }
  0x28   :  { %221 = vmatpush3.bf16.msra.mxu0 %v247_v1  ;;  %v252_v6 = vld [vmem:[#allocation5 + $0x28] sm:$0xff]   ;;  %v253_v7 = vld [vmem:[#allocation5 + $0x30] sm:$0xff]   ;;  %v254_v8 = vld [vmem:[#allocation5 + $0x38] sm:$0xff]   ;;  %s179_s12 = sshll.u32 %s334_s11, 4  ;;  %s180_s12 = int_to_ptr.vmem [resolvable:$true] %s179_s12 }
  0x29   :  { %222 = vmatprep.subr.bf16.mxu0 %v332_v0  ;;  %v255_v9 = vld [vmem:[#allocation2] sm:$0xff]   ;;  %s300_s13 = scalar_lea.vmem %s180_s12, 128  ;;  %p305_p3 = scmp.lt.s32.totalorder %s180_s12, %s180_s12 }
  0x2a   :  { %v192_v10 = vld [vmem:[%s405_s2] ss:$0 sm:$0xff]  ;;  %p301_p2 = scmp.ne.s32.totalorder %s180_s12, %s300_s13  ;;  %p306_p4 = scmp.lt.s32.totalorder %s300_s13, %s300_s13 }
  0x2c   :  { %223 = vmatpush3.bf16.msra.mxu0 %v248_v2  ;;  %p307_p5 = por %p306_p4, %p305_p3 }
  0x2d   :  { %224 = vmatprep.subr.bf16.mxu0 %v332_v0 }
  0x2e   :  { %p308_p6 = pnand %p307_p5, %p301_p2 }
  0x30   :  { %225 = vmatpush3.bf16.msra.mxu0 %v249_v3 }
  0x31   :  { %226 = vmatprep.subr.bf16.mxu0 %v332_v0 }
  0x34   :  { %227 = vmatpush3.bf16.msra.mxu0 %v250_v4 }
  0x35   :  { %228 = vmatprep.subr.bf16.mxu0 %v332_v0 }
  0x38   :  { %229 = vmatpush3.bf16.msra.mxu0 %v251_v5 }
  0x39   :  { %230 = vmatprep.subr.bf16.mxu0 %v332_v0 }
  0x3c   :  { %231 = vmatpush3.bf16.msra.mxu0 %v252_v6 }
  0x3d   :  { %232 = vmatprep.subr.bf16.mxu0 %v332_v0 }
  0x40   :  { %233 = vmatpush3.bf16.msra.mxu0 %v253_v7 }
  0x41   :  { %234 = vmatprep.subr.bf16.mxu0 %v332_v0 }
  0x44   :  { %235 = vmatpush3.bf16.msra.mxu0 %v254_v8 }
  0x47   :  { %237 = vmatmul.mubr.bf16.vlgmr.msra.gmra.mrb[0].mxu0 %v255_v9 }
 0x11a   :  { %v157_v11 = vpop.f32.mrb[0].mxu0 }
 0x11b   :  { %v238_v12 = vpop.f32.mrb[1].mxu0  ;;  %v158_v14 = vadd.f32 %v192_v10, %v157_v11 }
 0x11c   :  { %v160_v13 = vpop.f32.mrb[2].mxu0 }
 0x11d   :  { %v161_v15 = vadd.f32 %v192_v10, %v160_v13  ;;  %v239_v16 = vpop.f32.mrb[3].mxu0 }
 0x11f   :  { %v209_v17 = vpack.c.bf16 %v161_v15, %v158_v14 }
 0x121   :  { %210 = vst [vmem:[#allocation7] sm:$0xff] %v209_v17  }
 0x122   :  { %311 = shalt.err (!%p308_p6)
}
 0x123   :  { %s312_s15 = scalar_lea.hbm %s406_s3, 128 }
 0x124   :  { %p313_p7 = scmp.ne.s32.totalorder %s406_s3, %s312_s15  ;;  %p316_p8 = scmp.lt.u32.totalorder %s312_s15, %s406_s3 }
 0x126   :  { %p318_p9 = pnand %p316_p8, %p313_p7 }
 0x128   :  { %321 = shalt.err (!%p318_p9)
}
 0x129   :  { %185 = dma.vmem_to_hbm [thread:$0]  %s180_s12, 128, %s406_s3, [#allocation4], %s329_s22, %s329_s22, %s330_s23  }
 0x12a   :  { %326 = dma.done.wait [#allocation4], 128  }
 0x12b   :  { %327 = vsyncadd [#allocation4], 4294967168 }
 0x12c   :  { %189 = vsyncpa [#allocation3], 1 }
 0x12d   :  { %190 = vsyncpa [#allocation6], 1 }
 0x12e   :  { %191 = vsyncpa [#allocation4], 1 }

</bundles_post_ra>
